<compile_context>
chip_gen: v7x
topology: tpu7x:2x2x1
jax: 0.10.0
libtpu: 0.0.40
codegen_flags: <defaults>
</compile_context>

<pallas_src>
import functools

import jax
import jax.numpy as jnp
from jax.experimental import pallas as pl
from jax.experimental.pallas import tpu as pltpu


def _round_up(x, m):
    return (x + m - 1) // m * m


def _conv_pool_epilogue(emb, cw_ref, cb_ref, pooled_ref, *, K, L_out, KE_pad):
    """Shared body: im2col -> conv matmul (MXU) -> masked max-pool -> bias -> ReLU."""
    Bt, L_pad, E = emb.shape
    F_ = pooled_ref.shape[-1]
    L_out_pad = L_pad - K + 1                       # multiple of 8 by construction

    # im2col in VMEM: window t = rows t..t+K-1 concatenated along lanes, zero
    # padded up to KE_pad so the matmul contraction is 128-lane aligned.
    # TODO(synk): if the lowering shows relayout copies dominating around this
    # concat, build the windows in a VMEM scratch with explicit lane offsets.
    parts = [emb[:, k:k + L_out_pad, :] for k in range(K)]
    lane_pad = KE_pad - K * E
    if lane_pad:
        parts.append(jnp.zeros((Bt, L_out_pad, lane_pad), dtype=emb.dtype))
    win = jnp.concatenate(parts, axis=-1).reshape(Bt * L_out_pad, KE_pad)

    # Conv-as-matmul on the MXU: bf16 x bf16 -> f32 accumulate.
    conv = jnp.dot(win, cw_ref[...], preferred_element_type=jnp.float32)
    conv3 = conv.reshape(Bt, L_out_pad, F_)

    # Mask padded / partial windows with -inf (full-tile mask, no slice), pool
    # over the sequence, THEN add bias + ReLU (valid: ReLU is monotone and the
    # bias is constant over t).
    t_idx = jax.lax.broadcasted_iota(jnp.int32, conv3.shape, 1)
    masked = jnp.where(t_idx < L_out, conv3, -jnp.inf)
    pooled = jnp.max(masked, axis=1)                # (Bt, F)
    pooled_ref[...] = jnp.maximum(pooled + cb_ref[...], 0.0)


def textcnn_lut_kernel(ids_ref, table_ref, cw_ref, cb_ref, pooled_ref,
                       *, K, L_out, KE_pad):
    # ids_ref    : (Bt, L_pad)   int32 token ids (pad token = 0)
    # table_ref  : (V_pad, E)    bf16 embedding table, VMEM-resident
    # cw_ref     : (KE_pad, F)   bf16 conv weight, k-major / embed-minor
    # cb_ref     : (1, F)        f32 conv bias
    # pooled_ref : (Bt, F)       f32 per-filter global max after ReLU
    Bt, L_pad = ids_ref.shape
    V_pad, E = table_ref.shape
    ids = ids_ref[...]
    onehot = (jax.lax.broadcasted_iota(jnp.int32, (Bt, L_pad, V_pad), 2)
              == ids[:, :, None]).astype(jnp.bfloat16)
    emb = jnp.dot(onehot.reshape(Bt * L_pad, V_pad), table_ref[...],
                  preferred_element_type=jnp.float32)
    emb = emb.astype(jnp.bfloat16).reshape(Bt, L_pad, E)
    _conv_pool_epilogue(emb, cw_ref, cb_ref, pooled_ref,
                        K=K, L_out=L_out, KE_pad=KE_pad)


def textcnn_emb_kernel(emb_ref, cw_ref, cb_ref, pooled_ref,
                       *, K, L_out, KE_pad):
    # emb_ref : (Bt, L_pad, E) bf16 gathered embeddings (large-vocab fallback)
    _conv_pool_epilogue(emb_ref[...], cw_ref, cb_ref, pooled_ref,
                        K=K, L_out=L_out, KE_pad=KE_pad)


def textcnn_forward(x_ids, embed_table, conv_w, conv_b, fc_w, fc_b,
                    kernel_size, *, max_batch_tile=256,
                    prefer_in_kernel_lookup=True):
    """TextCNN forward: x_ids (B, L) int token ids -> (B, C) logits."""
    B, L = x_ids.shape
    V, E = embed_table.shape
    F_ = conv_b.shape[0]
    K = kernel_size
    L_out = L - K + 1

    # --- static tiling / padding decisions ---
    KE = K * E
    KE_pad = _round_up(KE, 128)          # lane-align the matmul contraction
    L_out_pad = _round_up(L_out, 8)      # sublane-align the flattened M dim
    L_pad = L_out_pad + K - 1
    Bt = min(B, max_batch_tile)
    # v7x has 2 TensorCores: keep >= 2 grid steps when halving the tile keeps
    # the (Bt, F) output block sublane-aligned (multiple of 8).
    if pl.cdiv(B, Bt) < 2 and Bt % 16 == 0:
        Bt //= 2
    B_pad = _round_up(B, Bt)
    n_steps = B_pad // Bt

    # --- glue (plain XLA): pad the cheap int32 ids, not the bf16 activation ---
    ids_pad = jnp.pad(x_ids.astype(jnp.int32),
                      ((0, B_pad - B), (0, L_pad - L)))       # pad token = 0
    cw = conv_w.reshape(F_, KE).T                             # (KE, F)
    cw = jnp.pad(cw, ((0, KE_pad - KE), (0, 0))).astype(jnp.bfloat16)
    cb = conv_b.reshape(1, F_).astype(jnp.float32)

    compiler_params = pltpu.CompilerParams(
        dimension_semantics=("parallel",),
        vmem_limit_bytes=48 * 1024 * 1024)   # above 16/32 MiB defaults, < v7x 64 MiB

    V_pad = _round_up(V, 128)
    table_bytes = V_pad * E * 2
    onehot_bytes = Bt * L_pad * V_pad * 2
    use_lut = (prefer_in_kernel_lookup
               and table_bytes <= (2 << 20)
               and onehot_bytes <= (8 << 20))

    def call_lut():
        table = jnp.pad(embed_table.astype(jnp.bfloat16),
                        ((0, V_pad - V), (0, 0)))
        kernel = functools.partial(textcnn_lut_kernel,
                                   K=K, L_out=L_out, KE_pad=KE_pad)
        return pl.pallas_call(
            kernel,
            out_shape=jax.ShapeDtypeStruct((B_pad, F_), jnp.float32),
            grid_spec=pltpu.PrefetchScalarGridSpec(
                num_scalar_prefetch=0,
                grid=(n_steps,),
                in_specs=[
                    pl.BlockSpec((Bt, L_pad), lambda b: (b, 0)),
                    pl.BlockSpec((V_pad, E), lambda b: (0, 0)),    # resident
                    pl.BlockSpec((KE_pad, F_), lambda b: (0, 0)),  # resident
                    pl.BlockSpec((1, F_), lambda b: (0, 0)),
                ],
                out_specs=pl.BlockSpec((Bt, F_), lambda b: (b, 0)),
            ),
            compiler_params=compiler_params,
        )(ids_pad, table, cw, cb)

    def call_gather():
        # Large vocab: one bf16 gather in XLA on the already-padded ids (no
        # extra pad round-trip of the (B, L, E) activation).
        emb = embed_table.astype(jnp.bfloat16)[ids_pad]       # (B_pad, L_pad, E)
        kernel = functools.partial(textcnn_emb_kernel,
                                   K=K, L_out=L_out, KE_pad=KE_pad)
        return pl.pallas_call(
            kernel,
            out_shape=jax.ShapeDtypeStruct((B_pad, F_), jnp.float32),
            grid_spec=pltpu.PrefetchScalarGridSpec(
                num_scalar_prefetch=0,
                grid=(n_steps,),
                in_specs=[
                    pl.BlockSpec((Bt, L_pad, E), lambda b: (b, 0, 0)),
                    pl.BlockSpec((KE_pad, F_), lambda b: (0, 0)),  # resident
                    pl.BlockSpec((1, F_), lambda b: (0, 0)),
                ],
                out_specs=pl.BlockSpec((Bt, F_), lambda b: (b, 0)),
            ),
            compiler_params=compiler_params,
        )(emb, cw, cb)

    if use_lut:
        try:
            pooled = jax.block_until_ready(call_lut())
        except Exception:
            # Safety net for older Mosaic relayout support: fall back to the
            # gather path rather than failing the forward pass.
            pooled = call_gather()
    else:
        pooled = call_gather()

    pooled = pooled[:B]                                       # drop batch padding
    # TODO(synk): dropout is identity (eval mode); no RNG mask applied.
    logits = pooled @ fc_w.T.astype(jnp.float32) + fc_b.astype(jnp.float32)
    return logits


def reference_forward(x_ids, embed_table, conv_w, conv_b, fc_w, fc_b, kernel_size):
    """Pure-JAX f32 reference mirroring the PyTorch forward."""
    K = kernel_size
    emb = embed_table[x_ids]                                  # (B, L, E)
    B, L, E = emb.shape
    F_ = conv_b.shape[0]
    L_out = L - K + 1
    windows = jnp.concatenate([emb[:, k:k + L_out, :] for k in range(K)], axis=-1)
    conv = jnp.einsum('btk,fk->btf', windows, conv_w.reshape(F_, K * E)) + conv_b
    act = jnp.maximum(conv, 0.0)
    pooled = jnp.max(act, axis=1)                             # (B, F)
    return pooled @ fc_w.T + fc_b


if __name__ == "__main__":
    # Small, deterministic config (shapes consistent with TextCNN's forward).
    vocab_size = 128
    embedding_dim = 32
    num_filters = 256
    kernel_size = 3
    n_class = 2
    B, L = 2, 16

    key = jax.random.PRNGKey(0)
    k_emb, k_cw, k_cb, k_fw, k_fb, k_ids = jax.random.split(key, 6)

    embed_table = jax.random.uniform(
        k_emb, (vocab_size, embedding_dim), jnp.float32, -1.0, 1.0)
    conv_w = jax.random.normal(
        k_cw, (num_filters, 1, kernel_size, embedding_dim), jnp.float32) * 0.1
    conv_b = jax.random.normal(k_cb, (num_filters,), jnp.float32) * 0.1
    fc_w = jax.random.normal(k_fw, (n_class, num_filters), jnp.float32) * 0.1
    fc_b = jax.random.normal(k_fb, (n_class,), jnp.float32) * 0.1
    x_ids = jax.random.randint(k_ids, (B, L), 0, vocab_size, jnp.int32)

    ref = reference_forward(x_ids, embed_table, conv_w, conv_b, fc_w, fc_b,
                            kernel_size)

    # Primary path: in-kernel one-hot embedding lookup (small vocab).
    out = textcnn_forward(x_ids, embed_table, conv_w, conv_b, fc_w, fc_b,
                          kernel_size)
    out = jax.block_until_ready(out)
    assert out.shape == (B, n_class)
    # bf16 MXU operands -> loosened tolerance vs the pure-f32 reference.
    assert jnp.allclose(out, ref, atol=5e-2, rtol=5e-2), (out, ref)

    # Also exercise the large-vocab fallback kernel (wrapper gather).
    out2 = textcnn_forward(x_ids, embed_table, conv_w, conv_b, fc_w, fc_b,
                           kernel_size, prefer_in_kernel_lookup=False)
    out2 = jax.block_until_ready(out2)
    assert jnp.allclose(out2, ref, atol=5e-2, rtol=5e-2), (out2, ref)

    print("KERNEL_OK")
</pallas_src>

<mosaic_0001>
module attributes {stable_mosaic.version = 11 : i64} {
  func.func @textcnn_lut_kernel(%arg0: i32, %arg1: memref<2x18xi32, #tpu.memory_space<vmem>>, %arg2: memref<128x32xbf16, #tpu.memory_space<vmem>>, %arg3: memref<128x256xbf16, #tpu.memory_space<vmem>>, %arg4: memref<1x256xf32, #tpu.memory_space<vmem>>, %arg5: memref<2x256xf32, #tpu.memory_space<vmem>>) attributes {dimension_semantics = [#tpu.dimension_semantics<parallel>], iteration_bounds = array<i64: 1>, scalar_prefetch = 0 : i64, scratch_operands = 0 : i64, tpu.core_type = #tpu.core_type<tc>, window_params = [{transform_indices = @transform_0, window_bounds = array<i64: 2, 18>}, {pipeline_mode = #tpu.pipeline_mode<synchronous>, transform_indices = @transform_1, window_bounds = array<i64: 128, 32>}, {pipeline_mode = #tpu.pipeline_mode<synchronous>, transform_indices = @transform_2, window_bounds = array<i64: 128, 256>}, {pipeline_mode = #tpu.pipeline_mode<synchronous>, transform_indices = @transform_3, window_bounds = array<i64: 1, 256>}, {transform_indices = @transform_4, window_bounds = array<i64: 2, 256>}]} {
    %c0 = arith.constant 0 : index
    %c0_0 = arith.constant 0 : index
    %0 = vector.load %arg1[%c0, %c0_0] : memref<2x18xi32, #tpu.memory_space<vmem>>, vector<2x18xi32>
    %1 = tpu.iota {dimensions = array<i32: 2>} : vector<2x18x128xi32>
    %2 = vector.shape_cast %0 : vector<2x18xi32> to vector<2x18x1xi32>
    %3 = vector.broadcast %2 : vector<2x18x1xi32> to vector<2x18x128xi32>
    %4 = arith.cmpi eq, %1, %3 : vector<2x18x128xi32>
    %5 = arith.extui %4 : vector<2x18x128xi1> to vector<2x18x128xi32>
    %6 = arith.sitofp %5 : vector<2x18x128xi32> to vector<2x18x128xf32>
    %7 = arith.truncf %6 : vector<2x18x128xf32> to vector<2x18x128xbf16>
    %8 = vector.shape_cast %7 : vector<2x18x128xbf16> to vector<36x128xbf16>
    %c0_1 = arith.constant 0 : index
    %c0_2 = arith.constant 0 : index
    %9 = vector.load %arg2[%c0_1, %c0_2] : memref<128x32xbf16, #tpu.memory_space<vmem>>, vector<128x32xbf16>
    %cst = arith.constant dense<0.000000e+00> : vector<36x32xf32>
    %10 = tpu.matmul %8, %9, %cst {dimension_numbers = #tpu.dot_dimension_numbers<[1], [0], [0], [1], [0, 0, 1, 1], [], []>} : vector<36x128xbf16>, vector<128x32xbf16>, vector<36x32xf32> -> vector<36x32xf32>
    %11 = arith.truncf %10 : vector<36x32xf32> to vector<36x32xbf16>
    %12 = vector.shape_cast %11 : vector<36x32xbf16> to vector<2x18x32xbf16>
    %13 = vector.extract_strided_slice %12 {offsets = [0, 0, 0], sizes = [2, 16, 32], strides = [1, 1, 1]} : vector<2x18x32xbf16> to vector<2x16x32xbf16>
    %14 = vector.extract_strided_slice %12 {offsets = [0, 1, 0], sizes = [2, 16, 32], strides = [1, 1, 1]} : vector<2x18x32xbf16> to vector<2x16x32xbf16>
    %15 = vector.extract_strided_slice %12 {offsets = [0, 2, 0], sizes = [2, 16, 32], strides = [1, 1, 1]} : vector<2x18x32xbf16> to vector<2x16x32xbf16>
    %cst_3 = arith.constant 0.000000e+00 : bf16
    %16 = vector.broadcast %cst_3 : bf16 to vector<2x16x32xbf16>
    %17 = tpu.concatenate %13, %14, %15, %16 in 2 : vector<2x16x32xbf16>, vector<2x16x32xbf16>, vector<2x16x32xbf16>, vector<2x16x32xbf16> -> vector<2x16x128xbf16>
    %18 = vector.shape_cast %17 : vector<2x16x128xbf16> to vector<32x128xbf16>
    %c0_4 = arith.constant 0 : index
    %c0_5 = arith.constant 0 : index
    %19 = vector.load %arg3[%c0_4, %c0_5] : memref<128x256xbf16, #tpu.memory_space<vmem>>, vector<128x256xbf16>
    %cst_6 = arith.constant dense<0.000000e+00> : vector<32x256xf32>
    %20 = tpu.matmul %18, %19, %cst_6 {dimension_numbers = #tpu.dot_dimension_numbers<[1], [0], [0], [1], [0, 0, 1, 1], [], []>} : vector<32x128xbf16>, vector<128x256xbf16>, vector<32x256xf32> -> vector<32x256xf32>
    %21 = vector.shape_cast %20 : vector<32x256xf32> to vector<2x16x256xf32>
    %22 = tpu.iota {dimensions = array<i32: 1>} : vector<2x16x256xi32>
    %c14_i32 = arith.constant 14 : i32
    %23 = vector.broadcast %c14_i32 : i32 to vector<2x16x256xi32>
    %24 = arith.cmpi slt, %22, %23 : vector<2x16x256xi32>
    %cst_7 = arith.constant 0xFF800000 : f32
    %25 = vector.broadcast %cst_7 : f32 to vector<2x16x256xf32>
    %26 = arith.select %24, %21, %25 : vector<2x16x256xi1>, vector<2x16x256xf32>
    %cst_8 = arith.constant dense<0xFF800000> : vector<2x256xf32>
    %27 = vector.multi_reduction <maximumf>, %26, %cst_8 [1] : vector<2x16x256xf32> to vector<2x256xf32>
    %c0_9 = arith.constant 0 : index
    %c0_10 = arith.constant 0 : index
    %28 = vector.load %arg4[%c0_9, %c0_10] : memref<1x256xf32, #tpu.memory_space<vmem>>, vector<1x256xf32>
    %29 = vector.broadcast %28 : vector<1x256xf32> to vector<2x256xf32>
    %30 = arith.addf %27, %29 : vector<2x256xf32>
    %cst_11 = arith.constant 0.000000e+00 : f32
    %31 = vector.broadcast %cst_11 : f32 to vector<2x256xf32>
    %32 = arith.maximumf %30, %31 : vector<2x256xf32>
    %c0_12 = arith.constant 0 : index
    %c0_13 = arith.constant 0 : index
    %33 = vector.load %arg5[%c0_12, %c0_13] : memref<2x256xf32, #tpu.memory_space<vmem>>, vector<2x256xf32>
    tpu.vector_store %arg5[%c0_12, %c0_13], %32 {strides = array<i32>} : memref<2x256xf32, #tpu.memory_space<vmem>>, vector<2x256xf32>,
    return
  }
  func.func @transform_0(%arg0: i32) -> (i32, i32) {
    %c0_i32 = arith.constant 0 : i32
    %c0_i32_0 = arith.constant 0 : i32
    return %arg0, %c0_i32 : i32, i32
  }
  func.func @transform_1(%arg0: i32) -> (i32, i32) {
    %c0_i32 = arith.constant 0 : i32
    %c0_i32_0 = arith.constant 0 : i32
    %c0_i32_1 = arith.constant 0 : i32
    return %c0_i32, %c0_i32_0 : i32, i32
  }
  func.func @transform_2(%arg0: i32) -> (i32, i32) {
    %c0_i32 = arith.constant 0 : i32
    %c0_i32_0 = arith.constant 0 : i32
    %c0_i32_1 = arith.constant 0 : i32
    return %c0_i32, %c0_i32_0 : i32, i32
  }
  func.func @transform_3(%arg0: i32) -> (i32, i32) {
    %c0_i32 = arith.constant 0 : i32
    %c0_i32_0 = arith.constant 0 : i32
    %c0_i32_1 = arith.constant 0 : i32
    return %c0_i32, %c0_i32_0 : i32, i32
  }
  func.func @transform_4(%arg0: i32) -> (i32, i32) {
    %c0_i32 = arith.constant 0 : i32
    %c0_i32_0 = arith.constant 0 : i32
    return %arg0, %c0_i32 : i32, i32
  }
}

module attributes {stable_mosaic.version = 11 : i64} {
  func.func @textcnn_emb_kernel(%arg0: i32, %arg1: memref<2x18x32xbf16, #tpu.memory_space<vmem>>, %arg2: memref<128x256xbf16, #tpu.memory_space<vmem>>, %arg3: memref<1x256xf32, #tpu.memory_space<vmem>>, %arg4: memref<2x256xf32, #tpu.memory_space<vmem>>) attributes {dimension_semantics = [#tpu.dimension_semantics<parallel>], iteration_bounds = array<i64: 1>, scalar_prefetch = 0 : i64, scratch_operands = 0 : i64, tpu.core_type = #tpu.core_type<tc>, window_params = [{transform_indices = @transform_0, window_bounds = array<i64: 2, 18, 32>}, {pipeline_mode = #tpu.pipeline_mode<synchronous>, transform_indices = @transform_1, window_bounds = array<i64: 128, 256>}, {pipeline_mode = #tpu.pipeline_mode<synchronous>, transform_indices = @transform_2, window_bounds = array<i64: 1, 256>}, {transform_indices = @transform_3, window_bounds = array<i64: 2, 256>}]} {
    %c0 = arith.constant 0 : index
    %c0_0 = arith.constant 0 : index
    %c0_1 = arith.constant 0 : index
    %0 = vector.load %arg1[%c0, %c0_0, %c0_1] : memref<2x18x32xbf16, #tpu.memory_space<vmem>>, vector<2x18x32xbf16>
    %1 = vector.extract_strided_slice %0 {offsets = [0, 0, 0], sizes = [2, 16, 32], strides = [1, 1, 1]} : vector<2x18x32xbf16> to vector<2x16x32xbf16>
    %2 = vector.extract_strided_slice %0 {offsets = [0, 1, 0], sizes = [2, 16, 32], strides = [1, 1, 1]} : vector<2x18x32xbf16> to vector<2x16x32xbf16>
    %3 = vector.extract_strided_slice %0 {offsets = [0, 2, 0], sizes = [2, 16, 32], strides = [1, 1, 1]} : vector<2x18x32xbf16> to vector<2x16x32xbf16>
    %cst = arith.constant 0.000000e+00 : bf16
    %4 = vector.broadcast %cst : bf16 to vector<2x16x32xbf16>
    %5 = tpu.concatenate %1, %2, %3, %4 in 2 : vector<2x16x32xbf16>, vector<2x16x32xbf16>, vector<2x16x32xbf16>, vector<2x16x32xbf16> -> vector<2x16x128xbf16>
    %6 = vector.shape_cast %5 : vector<2x16x128xbf16> to vector<32x128xbf16>
    %c0_2 = arith.constant 0 : index
    %c0_3 = arith.constant 0 : index
    %7 = vector.load %arg2[%c0_2, %c0_3] : memref<128x256xbf16, #tpu.memory_space<vmem>>, vector<128x256xbf16>
    %cst_4 = arith.constant dense<0.000000e+00> : vector<32x256xf32>
    %8 = tpu.matmul %6, %7, %cst_4 {dimension_numbers = #tpu.dot_dimension_numbers<[1], [0], [0], [1], [0, 0, 1, 1], [], []>} : vector<32x128xbf16>, vector<128x256xbf16>, vector<32x256xf32> -> vector<32x256xf32>
    %9 = vector.shape_cast %8 : vector<32x256xf32> to vector<2x16x256xf32>
    %10 = tpu.iota {dimensions = array<i32: 1>} : vector<2x16x256xi32>
    %c14_i32 = arith.constant 14 : i32
    %11 = vector.broadcast %c14_i32 : i32 to vector<2x16x256xi32>
    %12 = arith.cmpi slt, %10, %11 : vector<2x16x256xi32>
    %cst_5 = arith.constant 0xFF800000 : f32
    %13 = vector.broadcast %cst_5 : f32 to vector<2x16x256xf32>
    %14 = arith.select %12, %9, %13 : vector<2x16x256xi1>, vector<2x16x256xf32>
    %cst_6 = arith.constant dense<0xFF800000> : vector<2x256xf32>
    %15 = vector.multi_reduction <maximumf>, %14, %cst_6 [1] : vector<2x16x256xf32> to vector<2x256xf32>
    %c0_7 = arith.constant 0 : index
    %c0_8 = arith.constant 0 : index
    %16 = vector.load %arg3[%c0_7, %c0_8] : memref<1x256xf32, #tpu.memory_space<vmem>>, vector<1x256xf32>
    %17 = vector.broadcast %16 : vector<1x256xf32> to vector<2x256xf32>
    %18 = arith.addf %15, %17 : vector<2x256xf32>
    %cst_9 = arith.constant 0.000000e+00 : f32
    %19 = vector.broadcast %cst_9 : f32 to vector<2x256xf32>
    %20 = arith.maximumf %18, %19 : vector<2x256xf32>
    %c0_10 = arith.constant 0 : index
    %c0_11 = arith.constant 0 : index
    %21 = vector.load %arg4[%c0_10, %c0_11] : memref<2x256xf32, #tpu.memory_space<vmem>>, vector<2x256xf32>
    tpu.vector_store %arg4[%c0_10, %c0_11], %20 {strides = array<i32>} : memref<2x256xf32, #tpu.memory_space<vmem>>, vector<2x256xf32>,
    return
  }
  func.func @transform_0(%arg0: i32) -> (i32, i32, i32) {
    %c0_i32 = arith.constant 0 : i32
    %c0_i32_0 = arith.constant 0 : i32
    %c0_i32_1 = arith.constant 0 : i32
    return %arg0, %c0_i32, %c0_i32_0 : i32, i32, i32
  }
  func.func @transform_1(%arg0: i32) -> (i32, i32) {
    %c0_i32 = arith.constant 0 : i32
    %c0_i32_0 = arith.constant 0 : i32
    %c0_i32_1 = arith.constant 0 : i32
    return %c0_i32, %c0_i32_0 : i32, i32
  }
  func.func @transform_2(%arg0: i32) -> (i32, i32) {
    %c0_i32 = arith.constant 0 : i32
    %c0_i32_0 = arith.constant 0 : i32
    %c0_i32_1 = arith.constant 0 : i32
    return %c0_i32, %c0_i32_0 : i32, i32
  }
  func.func @transform_3(%arg0: i32) -> (i32, i32) {
    %c0_i32 = arith.constant 0 : i32
    %c0_i32_0 = arith.constant 0 : i32
    return %arg0, %c0_i32 : i32, i32
  }
}

</mosaic_0001>

<bundles_post_ra>
// kernel: tpu_custom_call.1
= control target key start
LH: loop header
LB: loop body
LE: loop exit
PB: predicated region body
PF: predicated region fallthrough
CT: control target
= control target key end

     0   :  { %9 = vsyncpa [#allocation3], 0  ;;  %s1492_s0 = inlined_call_operand.vmem [shape: s32[2,18], index: 0, kind: input, shape index: {}]   ;;  %s1493_s1 = inlined_call_operand.vmem [shape: bf16[128,32], index: 1, kind: input, shape index: {}]   ;;  %s1494_s2 = inlined_call_operand.hbm [shape: bf16[128,256], index: 2, kind: input, shape index: {}]   ;;  %s1495_s3 = inlined_call_operand.vmem [shape: f32[1,256], index: 3, kind: input, shape index: {}]   ;;  %s1496_s4 = inlined_call_operand.hbm [shape: f32[2,256], index: 4, kind: output, shape index: {}]  }
   0x1   :  { %10 = vsyncpa [#allocation4], 0  ;;  %s1285_s15 = smov [#allocation2]   ;;  %s1237_s19 = scalar_lea.hbm %s1494_s2, 2048 }
   0x2   :  { %s20_s16 = sshll.u32 %s1285_s15, 4  ;;  %p1238_p0 = scmp.ne.s32.totalorder %s1494_s2, %s1237_s19  ;;  %s21_s16 = int_to_ptr.vmem [resolvable:$true] %s20_s16 }
   0x3   :  { %p1241_p1 = scmp.lt.u32.totalorder %s1237_s19, %s1494_s2 }
   0x5   :  { %p1243_p2 = pnand %p1241_p1, %p1238_p0 }
   0x7   :  { %1246 = shalt.err (!%p1243_p2)
}
   0x8   :  { %s1247_s24 = scalar_lea.vmem %s21_s16, 2048  ;;  %p1252_p4 = scmp.lt.s32.totalorder %s21_s16, %s21_s16 }
   0x9   :  { %p1248_p3 = scmp.ne.s32.totalorder %s21_s16, %s1247_s24  ;;  %p1253_p5 = scmp.lt.s32.totalorder %s1247_s24, %s1247_s24 }
   0xb   :  { %p1254_p6 = por %p1253_p5, %p1252_p4 }
   0xd   :  { %p1255_p7 = pnand %p1254_p6, %p1248_p3 }
   0xf   :  { %1258 = shalt.err (!%p1255_p7)
}
  0x10   :  { %s1286_s25 = smov 128   ;;  %s1287_s26 = smov 8  }
  0x11   :  { %26 = dma.hbm_to_vmem [thread:$0]  %s1494_s2, 2048, %s21_s16, [#allocation3], %s1286_s25, %s1286_s25, %s1287_s26  }
  0x12   :  { %1281 = dma.done.wait [#allocation3], 2048  }
  0x13   :  { %1282 = vsyncadd [#allocation3], 4294965248  ;;  %v34_v0 = vlaneseq  ;;  %v1288_v1 = vmov 0.0   ;;  %v33_v5 = vld [vmem:[%s1492_s0] sm:$0x3]  ;;  %v1206_v9 = vld [vmem:[%s1493_s1 + $0x8] sm:$0xff]  }
  0x14   :  { %1166 = vmatprep.subr.bf16.mxu0 %v1288_v1  ;;  %v1205_v8 = vld [vmem:[%s1493_s1] sm:$0xff]   ;;  %v1207_v10 = vld [vmem:[%s1493_s1 + $0x10] sm:$0xff]   ;;  %v1208_v11 = vld [vmem:[%s1493_s1 + $0x18] sm:$0xff]   ;;  %vm1289_vm0 = vmmov 0   ;;  %v1290_v16 = vmov 1966171168  }
  0x15   :  { %v1334_v2 = vshrl.u32 %v34_v0, 7  ;;  %1167 = vmatpush3.bf16.msra.mxu0 %v1205_v8  ;;  %1182 = vmatprep.mubr.msk.bf16.mxu0 %vm1289_vm0, %v1288_v1  ;;  %v1209_v12 = vld [vmem:[%s1493_s1 + $0x20] sm:$0xff]   ;;  %v1210_v13 = vld [vmem:[%s1493_s1 + $0x28] sm:$0xff]   ;;  %v1211_v14 = vld [vmem:[%s1493_s1 + $0x30] sm:$0xff]   ;;  %v94_v17 = vunpack.c.l.s4 %v1290_v16  ;;  %v35_v18 = vand.u32 127, %v34_v0  ;;  %s1293_s19 = smov 32  }
  0x16   :  { %1168 = vmatprep.subr.bf16.mxu0 %v1288_v1  ;;  %v1212_v15 = vld [vmem:[%s1493_s1 + $0x38] sm:$0xff]   ;;  %vm706_vm7 = vsmask.f32 7424  ;;  %s1291_s1 = smov 64   ;;  %vm837_vm8 = vcmask 261120   ;;  %vm842_vm9 = vcmask 523264  }
  0x17   :  { %v53_v3 = vsub.s32 1, %v1334_v2  ;;  %v38_v4 = vsub.s32 0, %v1334_v2  ;;  %v95_v21 = vunpack.c.0.s8 %v94_v17  ;;  %vm847_vm10 = vcmask 785408  }
  0x18   :  { %vm1088_vm12 = vcmask 1041409   ;;  %vm1090_vm13 = vcmask 1043459   ;;  %vm1092_vm14 = vcmask 1045509   ;;  %vm1094_vm15 = vcmask 1047559  }
  0x19   :  { %v54_v6 = vrot.slane %v33_v5, %v53_v3  ;;  %v39_v7 = vrot.slane %v33_v5, %v38_v4  ;;  %1169 = vmatpush3.bf16.msra.mxu0 %v1206_v9  ;;  %v1380_v25 = vsub.s32 %v95_v21, %v1334_v2 }
  0x1a   :  { %1170 = vmatprep.subr.bf16.mxu0 %v1288_v1 }
  0x1b   :  { %56 = vbcast.lane.b32.xlu1 %v54_v6, 256  ;;  %41 = vbcast.lane.b32.xlu0 %v39_v7, 256 }
  0x1d   :  { %1171 = vmatpush3.bf16.msra.mxu0 %v1207_v10 }
  0x1e   :  { %1172 = vmatprep.subr.bf16.mxu0 %v1288_v1 }
  0x1f   :  { %60 = vbcast.lane.b32.xlu1 %v54_v6, 264  ;;  %45 = vbcast.lane.b32.xlu0 %v39_v7, 264 }
  0x21   :  { %1173 = vmatpush3.bf16.msra.mxu0 %v1208_v11 }
  0x22   :  { %1174 = vmatprep.subr.bf16.mxu0 %v1288_v1 }
  0x23   :  { %49 = vbcast.lane.b32.xlu0 %v39_v7, 272  ;;  %64 = vbcast.lane.b32.xlu1 %v54_v6, 272 }
  0x25   :  { %1175 = vmatpush3.bf16.msra.mxu0 %v1209_v12 }
  0x26   :  { %1176 = vmatprep.subr.bf16.mxu0 %v1288_v1 }
  0x29   :  { %1177 = vmatpush3.bf16.msra.mxu0 %v1210_v13 }
  0x2a   :  { %1178 = vmatprep.subr.bf16.mxu0 %v1288_v1 }
  0x2d   :  { %1179 = vmatpush3.bf16.msra.mxu0 %v1211_v14 }
  0x2e   :  { %1180 = vmatprep.subr.bf16.mxu0 %v1288_v1 }
  0x31   :  { %1181 = vmatpush3.bf16.msra.mxu0 %v1212_v15 }
  0x8d   :  { %v57_v19 = vpop.permute.xlu1 %56  ;;  %v42_v20 = vpop.permute.xlu0 %41 }
  0x8e   :  { %vm69_vm1 = vcmp.eq.s32.totalorder %v35_v18, %v57_v19  ;;  %vm66_vm2 = vcmp.eq.s32.totalorder %v35_v18, %v42_v20 }
  0x8f   :  { %v1116_v22 = vsel %vm69_vm1, 1.0, %v1288_v1  ;;  %v1113_v26 = vsel %vm66_vm2, 1.0, %v1288_v1 }
  0x91   :  { %v61_v23 = vpop.permute.xlu1 %60  ;;  %v46_v24 = vpop.permute.xlu0 %45 }
  0x92   :  { %vm70_vm3 = vcmp.eq.s32.totalorder %v35_v18, %v61_v23  ;;  %vm67_vm4 = vcmp.eq.s32.totalorder %v35_v18, %v46_v24 }
  0x93   :  { %v1117_v27 = vsel %vm70_vm3, 1.0, %v1288_v1  ;;  %v1114_v28 = vsel %vm67_vm4, 1.0, %v1288_v1 }
  0x94   :  { %v86_v29 = vpack.c.bf16 %v1117_v27, %v1116_v22  ;;  %v1120_v30 = vpack.c.bf16 %v1117_v27, %v1117_v27  ;;  %v84_v31 = vpack.c.bf16 %v1114_v28, %v1113_v26  ;;  %v1119_v32 = vpack.c.bf16 %v1114_v28, %v1114_v28 }
  0x95   :  { %v50_v33 = vpop.permute.xlu0 %49  ;;  %v65_v38 = vpop.permute.xlu1 %64 }
  0x96   :  { %v162_v34 = vrot.slane %v86_v29, %v1380_v25  ;;  %v169_v35 = vrot.slane %v1120_v30, %v1380_v25  ;;  %v99_v36 = vrot.slane %v84_v31, %v1380_v25  ;;  %v106_v37 = vrot.slane %v1119_v32, %v1380_v25 }
  0x97   :  { %vm68_vm5 = vcmp.eq.s32.totalorder %v35_v18, %v50_v33  ;;  %vm71_vm6 = vcmp.eq.s32.totalorder %v35_v18, %v65_v38  ;;  %v1213_v33 = vld [vmem:[#allocation2 + $0x4] ss:$8 sps:$4 sm:$0xff]   ;;  %v1221_v38 = vld [vmem:[#allocation2 + $0x20] ss:$8 sps:$4 sm:$0xff]  }
  0x98   :  { %v170_v39 = vcombine.high %v162_v34, %v162_v34  ;;  %v171_v40 = vcombine.high %v169_v35, %v169_v35  ;;  %v178_v41 = vrot.slane %v162_v34, %v1380_v25  ;;  %v185_v42 = vrot.slane %v169_v35, %v1380_v25  ;;  %v1215_v34 = vld [vmem:[#allocation2] ss:$8 sps:$4 sm:$0xff]   ;;  %v1216_v35 = vld [vmem:[#allocation2 + $0x14] ss:$8 sps:$4 sm:$0xff]   ;;  %949 = vmatprep.subr.bf16.mxu1 %v1213_v33 }
  0x99   :  { %v107_v43 = vcombine.high %v99_v36, %v99_v36  ;;  %v108_v44 = vcombine.high %v106_v37, %v106_v37  ;;  %v115_v45 = vrot.slane %v99_v36, %v1380_v25  ;;  %v122_v50 = vrot.slane %v106_v37, %v1380_v25  ;;  %950 = vmatpush1.bf16.msra.mxu1 %v1215_v34  ;;  %v1218_v36 = vld [vmem:[#allocation2 + $0x10] ss:$8 sps:$4 sm:$0xff]   ;;  %v1219_v37 = vld [vmem:[#allocation2 + $0x24] ss:$8 sps:$4 sm:$0xff]  }
  0x9a   :  { %v192_v46 = vrot.slane %v170_v39, %v1380_v25  ;;  %v199_v47 = vrot.slane %v171_v40, %v1380_v25  ;;  %v200_v48 = vcombine.high %v178_v41, %v178_v41  ;;  %v201_v49 = vcombine.high %v185_v42, %v185_v42  ;;  %951 = vmatprep.subr.bf16.mxu1 %v1216_v35  ;;  %v1222_v39 = vld [vmem:[#allocation2 + $0x34] ss:$8 sps:$4 sm:$0xff]   ;;  %v1224_v40 = vld [vmem:[#allocation2 + $0x30] ss:$8 sps:$4 sm:$0xff]  }
  0x9b   :  { %v129_v51 = vrot.slane %v107_v43, %v1380_v25  ;;  %v136_v52 = vrot.slane %v108_v44, %v1380_v25  ;;  %v1115_v53 = vsel %vm68_vm5, 1.0, %v1288_v1  ;;  %v1118_v57 = vsel %vm71_vm6, 1.0, %v1288_v1  ;;  %v1230_v43 = vld [vmem:[#allocation2 + $0x50] ss:$8 sps:$4 sm:$0xff]   ;;  %v1231_v44 = vld [vmem:[#allocation2 + $0x64] ss:$8 sps:$4 sm:$0xff]  }
  0x9c   :  { %v202_v54 = vcombine.high %v192_v46, %v192_v46  ;;  %v286_v55 = vcombine.low %v199_v47, %v201_v49  ;;  %v85_v56 = vpack.c.bf16 %v1115_v53, %v1115_v53  ;;  %v284_v62 = vcombine.low %v192_v46, %v200_v48  ;;  %v1234_v46 = vld [vmem:[#allocation2 + $0x74] ss:$8 sps:$4 sm:$0xff]  }
  0x9d   :  { %v234_v58 = vcombine.low %v115_v45, %v129_v51  ;;  %v1121_v59 = vcombine.high %v115_v45, %v129_v51  ;;  %v236_v60 = vcombine.low %v122_v50, %v136_v52  ;;  %v1122_v61 = vcombine.high %v122_v50, %v136_v52  ;;  %952 = vmatpush1.bf16.msra.mxu1 %v1218_v36  ;;  %v1233_v45 = vld [vmem:[#allocation2 + $0x60] ss:$8 sps:$4 sm:$0xff]  }
  0x9e   :  { %v285_v63 = vcombine.low %v202_v54, %v185_v42  ;;  %v147_v0 = vrot.slane %v85_v56, %v1380_v25  ;;  %v87_v10 = vpack.c.bf16 %v1118_v57, %v1118_v57  ;;  %v314_v14 = vrot.slane %v286_v55, %v1380_v25  ;;  %953 = vmatprep.subr.bf16.mxu1 %v1219_v37  ;;  %v1228_v42 = vld [vmem:[#allocation2 + $0x54] ss:$8 sps:$4 sm:$0xff]  }
  0x9f   :  { %v244_v5 = vrot.slane %v234_v58, %v1380_v25  ;;  %v251_v6 = vrot.slane %v1121_v59, %v1380_v25  ;;  %v258_v7 = vrot.slane %v236_v60, %v1380_v25  ;;  %v265_v8 = vrot.slane %v1122_v61, %v1380_v25 }
  0xa0   :  { %v154_v9 = vrot.slane %v147_v0, %v1380_v25  ;;  %v307_v13 = vrot.slane %v285_v63, %v1380_v25  ;;  %v300_v16 = vrot.slane %v284_v62, %v1380_v25  ;;  %v210_v20 = vrot.slane %v87_v10, %v1380_v25 }
  0xa1   :  { %v266_v11 = vcombine.low %v244_v5, %v251_v6  ;;  %v267_v12 = vcombine.low %v258_v7, %v265_v8  ;;  %v203_v24 = vcombine.high %v199_v47, %v199_v47  ;;  %954 = vmatpush1.bf16.msra.mxu1 %v1221_v38 }
  0xa2   :  { %v283_v15 = vcombine.low %v154_v9, %v178_v41  ;;  %v316_v22 = vcombine.low %v307_v13, %v314_v14  ;;  %v217_v26 = vrot.slane %v210_v20, %v1380_v25  ;;  %955 = vmatprep.subr.bf16.mxu1 %v1222_v39  ;;  %v1227_v41 = vld [vmem:[#allocation2 + $0x40] ss:$8 sps:$4 sm:$0xff]  }
  0xa3   :  { %v274_v17 = vrot.slane %v266_v11, %v1380_v25  ;;  %v281_v18 = vrot.slane %v267_v12, %v1380_v25 }
  0xa4   :  { %v293_v19 = vrot.slane %v283_v15, %v1380_v25  ;;  %v330_v28 = vrot.slane %v316_v22, %v1380_v25  ;;  %v332_v29 = vcombine.low %v203_v24, %v217_v26 }
  0xa5   :  { %v282_v21 = vcombine.low %v274_v17, %v281_v18  ;;  %956 = vmatpush1.bf16.msra.mxu1 %v1224_v40 }
  0xa6   :  { %v315_v23 = vcombine.low %v293_v19, %v300_v16  ;;  %v339_v31 = vrot.slane %v332_v29, %v1380_v25 }
  0xa7   :  { %1183 = vmatmul.mubr.bf16.vlgmr.msra.gmra.mrb[0].mxu0 %v282_v21 }
  0xa8   :  { %1186 = vmatprep.mubr.msk.bf16.mxu0 %vm1289_vm0, %v1288_v1  ;;  %v323_v27 = vrot.slane %v315_v23, %v1380_v25  ;;  %v346_v32 = vrot.slane %v339_v31, %v1380_v25 }
  0xaa   :  { %v331_v30 = vcombine.low %v323_v27, %v330_v28  ;;  %v1236_v27 = vld [vmem:[#allocation2 + $0x70] ss:$8 sps:$4 sm:$0xff]  }
  0xaf   :  { %1187 = vmatmul.mubr.bf16.gmra.mrb[4].mxu0 %v331_v30 }
  0xb0   :  { %1190 = vmatprep.mubr.msk.bf16.mxu0 %vm1289_vm0, %v1288_v1  ;;  %v1225_v1 = vld [vmem:[#allocation2 + $0x44] ss:$8 sps:$4 sm:$0xff]  }
  0xb1   :  { %957 = vmatprep.subr.bf16.mxu1 %v1225_v1 }
  0xb2   :  { %958 = vmatpush1.bf16.msra.mxu1 %v1227_v41 }
  0xb3   :  { %959 = vmatprep.subr.bf16.mxu1 %v1228_v42 }
  0xb6   :  { %960 = vmatpush1.bf16.msra.mxu1 %v1230_v43 }
  0xb7   :  { %1191 = vmatmul.mubr.bf16.gmra.mrb[8].mxu0 %v346_v32  ;;  %961 = vmatprep.subr.bf16.mxu1 %v1231_v44 }
  0xba   :  { %962 = vmatpush1.bf16.msra.mxu1 %v1233_v45 }
  0xbb   :  { %963 = vmatprep.subr.bf16.mxu1 %v1234_v46 }
  0xbe   :  { %964 = vmatpush1.bf16.msra.mxu1 %v1236_v27 }
 0x17a   :  { %v432_v47 = vpop.f32.mrb[0].mxu0 }
 0x17b   :  { %v1184_v48 = vpop.f32.mrb[1].mxu0 }
 0x17c   :  { %v435_v49 = vpop.f32.mrb[2].mxu0 }
 0x17d   :  { %v454_v50 = vpack.c.bf16 %v435_v49, %v432_v47  ;;  %v1131_v51 = vpack.c.bf16 %v435_v49, %v435_v49  ;;  %v1185_v52 = vpop.f32.mrb[3].mxu0 }
 0x17f   :  { %v467_v53 = vrot.slane %v454_v50, %v1380_v25  ;;  %v474_v54 = vrot.slane %v1131_v51, %v1380_v25 }
 0x181   :  { %v475_v55 = vcombine.high %v467_v53, %v467_v53  ;;  %v476_v56 = vcombine.high %v474_v54, %v474_v54  ;;  %v483_v57 = vrot.slane %v467_v53, %v1380_v25  ;;  %v490_v58 = vrot.slane %v474_v54, %v1380_v25 }
 0x182   :  { %v440_v59 = vpop.f32.mrb[4].mxu0 }
 0x183   :  { %v497_v60 = vrot.slane %v475_v55, %v1380_v25  ;;  %v504_v61 = vrot.slane %v476_v56, %v1380_v25  ;;  %v1188_v62 = vpop.f32.mrb[5].mxu0  ;;  %v505_v63 = vcombine.high %v483_v57, %v483_v57  ;;  %v506_v0 = vcombine.high %v490_v58, %v490_v58 }
 0x184   :  { %v443_v5 = vpop.f32.mrb[6].mxu0 }
 0x185   :  { %v580_v6 = vcombine.low %v483_v57, %v497_v60  ;;  %v1133_v7 = vcombine.high %v483_v57, %v497_v60  ;;  %v582_v8 = vcombine.low %v490_v58, %v504_v61  ;;  %v1134_v9 = vcombine.high %v490_v58, %v504_v61  ;;  %v1189_v10 = vpop.f32.mrb[7].mxu0 }
 0x186   :  { %v455_v11 = vpack.c.bf16 %v443_v5, %v440_v59  ;;  %v1132_v12 = vpack.c.bf16 %v443_v5, %v443_v5  ;;  %v507_v13 = vcombine.high %v497_v60, %v497_v60  ;;  %v735_v20 = vcombine.low %v497_v60, %v505_v63 }
 0x187   :  { %v590_v14 = vrot.slane %v580_v6, %v1380_v25  ;;  %v597_v15 = vrot.slane %v1133_v7, %v1380_v25  ;;  %v604_v16 = vrot.slane %v582_v8, %v1380_v25  ;;  %v611_v17 = vrot.slane %v1134_v9, %v1380_v25 }
 0x188   :  { %v516_v18 = vrot.slane %v455_v11, %v1380_v25  ;;  %v523_v19 = vrot.slane %v1132_v12, %v1380_v25  ;;  %v736_v21 = vcombine.low %v507_v13, %v490_v58  ;;  %v508_v23 = vcombine.high %v504_v61, %v504_v61 }
 0x189   :  { %v612_v22 = vcombine.low %v590_v14, %v597_v15  ;;  %v737_v24 = vcombine.low %v504_v61, %v506_v0  ;;  %v613_v26 = vcombine.low %v604_v16, %v611_v17  ;;  %v745_v35 = vrot.slane %v735_v20, %v1380_v25 }
 0x18a   :  { %v524_v28 = vcombine.high %v516_v18, %v516_v18  ;;  %v525_v29 = vcombine.high %v523_v19, %v523_v19  ;;  %v532_v30 = vrot.slane %v516_v18, %v1380_v25  ;;  %v539_v31 = vrot.slane %v523_v19, %v1380_v25  ;;  %v448_v32 = vpop.f32.mrb[8].mxu0 }
 0x18b   :  { %v456_v33 = vpack.c.bf16 %v448_v32, %v448_v32  ;;  %v1192_v34 = vpop.f32.mrb[9].mxu0  ;;  %v752_v36 = vrot.slane %v736_v21, %v1380_v25  ;;  %v759_v37 = vrot.slane %v737_v24, %v1380_v25  ;;  %v620_v46 = vrot.slane %v612_v22, %v1380_v25 }
 0x18c   :  { %v546_v38 = vrot.slane %v524_v28, %v1380_v25  ;;  %v553_v39 = vrot.slane %v525_v29, %v1380_v25  ;;  %v554_v40 = vcombine.high %v532_v30, %v532_v30  ;;  %v555_v1 = vcombine.high %v539_v31, %v539_v31  ;;  %v451_v41 = vpop.f32.mrb[10].mxu0 }
 0x18d   :  { %v564_v42 = vrot.slane %v456_v33, %v1380_v25  ;;  %v1193_v43 = vpop.f32.mrb[11].mxu0  ;;  %v738_v44 = vcombine.low %v508_v23, %v532_v30  ;;  %v767_v45 = vcombine.low %v745_v35, %v752_v36  ;;  %v627_v58 = vrot.slane %v613_v26, %v1380_v25 }
 0x18e   :  { %v556_v47 = vcombine.high %v546_v38, %v546_v38  ;;  %v629_v48 = vcombine.low %v546_v38, %v554_v40  ;;  %v557_v49 = vcombine.high %v553_v39, %v553_v39  ;;  %v631_v50 = vcombine.low %v553_v39, %v555_v1 }
 0x18f   :  { %v565_v51 = vcombine.high %v564_v42, %v564_v42  ;;  %v572_v52 = vrot.slane %v564_v42, %v1380_v25  ;;  %v766_v53 = vrot.slane %v738_v44, %v1380_v25  ;;  %v775_v54 = vrot.slane %v767_v45, %v1380_v25 }
 0x190   :  { %v630_v55 = vcombine.low %v556_v47, %v539_v31  ;;  %v639_v56 = vrot.slane %v629_v48, %v1380_v25  ;;  %v653_v57 = vrot.slane %v631_v50, %v1380_v25  ;;  %v684_v62 = vrot.slane %v532_v30, %v1380_v25 }
 0x191   :  { %v579_v59 = vrot.slane %v565_v51, %v1380_v25  ;;  %v632_v60 = vcombine.low %v557_v49, %v572_v52  ;;  %v768_v61 = vcombine.low %v759_v37, %v766_v53  ;;  %v628_v0 = vcombine.low %v620_v46, %v627_v58 }
 0x192   :  { %v646_v63 = vrot.slane %v630_v55, %v1380_v25  ;;  %v1135_v5 = vcombine.high %v532_v30, %v546_v38  ;;  %v785_v6 = vcombine.low %v539_v31, %v553_v39  ;;  %v691_v12 = vrot.slane %v684_v62, %v1380_v25 }
 0x193   :  { %v660_v7 = vrot.slane %v632_v60, %v1380_v25  ;;  %v698_v8 = vrot.slane %v579_v59, %v1380_v25  ;;  %v787_v9 = vcombine.low %v572_v52, %v579_v59  ;;  %v782_v10 = vrot.slane %v768_v61, %v1380_v25 }
 0x194   :  { %v661_v11 = vcombine.low %v639_v56, %v646_v63  ;;  %v708_v13 = vshrl.u32 %v628_v0, 16  ;;  %v710_v14 = vshll.u32 %v628_v0, 16  ;;  %v1136_v18 = vcombine.high %v539_v31, %v553_v39 }
 0x195   :  { %v662_v15 = vcombine.low %v653_v57, %v660_v7  ;;  %v815_v16 = vrot.slane %v787_v9, %v1380_v25  ;;  %v783_v17 = vcombine.low %v775_v54, %v782_v10  ;;  %v715_v20 = vshll.u32 %v691_v12, 16 }
 0x196   :  { %v712_v19 = vrot.slane %v710_v14, 1  ;;  %v794_v21 = vrot.slane %v1135_v5, %v1380_v25  ;;  %v801_v22 = vrot.slane %v785_v6, %v1380_v25  ;;  %v808_v24 = vrot.slane %v1136_v18, %v1380_v25 }
 0x197   :  { %v676_v23 = vrot.slane %v662_v15, %v1380_v25  ;;  %833 = vrot.lane.b32.xlu1 %v783_v17, %s1291_s1  ;;  %v669_v26 = vrot.slane %v661_v11, %v1380_v25  ;;  %v705_v27 = vrot.slane %v698_v8, %v1380_v25  ;;  %v717_v29 = vrot.slane %v715_v20, 1  ;;  %v1043_v8 = vld [vmem:[%s1495_s3] sm:$0x3]  ;;  %s1295_s3 = smov [#allocation5]  }
 0x198   :  { %v713_v28 = vor.u32 %v712_v19, %v708_v13  ;;  %v816_v30 = vcombine.low %v794_v21, %v801_v22  ;;  %v817_v31 = vcombine.low %v808_v24, %v815_v16  ;;  %v1292_v33 = vmov 0   ;;  %s1104_s22 = sshll.u32 %s1295_s3, 4  ;;  %s1105_s22 = int_to_ptr.vmem [resolvable:$true] %s1104_s22 }
 0x199   :  { %v677_v32 = vcombine.low %v669_v26, %v676_v23  ;;  %981 = vmatprep.mubr.bf16.mxu1 %v1292_v33  ;;  %v727_v38 = vshll.u32 %v705_v27, 16  ;;  %v1004_v51 = vadd.s32 8, %v1334_v2  ;;  %v1048_v17 = vrot.slane %v1043_v8, %v38_v4  ;;  %s1259_s23 = scalar_lea.vmem %s1105_s22, 64  ;;  %p1264_p9 = scmp.lt.s32.totalorder %s1105_s22, %s1105_s22 }
 0x19a   :  { %v718_v34 = vsel %vm706_vm7, %v713_v28, %v717_v29  ;;  %v824_v35 = vrot.slane %v816_v30, %v1380_v25  ;;  %v831_v36 = vrot.slane %v817_v31, %v1380_v25  ;;  %v1052_v20 = vrot.slane %v1043_v8, %v53_v3  ;;  %p1260_p8 = scmp.ne.s32.totalorder %s1105_s22, %s1259_s23  ;;  %p1265_p10 = scmp.lt.s32.totalorder %s1259_s23, %s1259_s23 }
 0x19b   :  { %731 = vrot.lane.b32.xlu0 %v718_v34, %s1293_s19  ;;  %v722_v37 = vshll.u32 %v677_v32, 16  ;;  %v720_v40 = vshrl.u32 %v677_v32, 16  ;;  %v729_v42 = vrot.slane %v727_v38, 1  ;;  %vm1006_vm11 = vcmp.lt.s32.totalorder %v1004_v51, 14 }
 0x19c   :  { %v832_v39 = vcombine.low %v824_v35, %v831_v36  ;;  %v1294_v38 = vmov 1983009808   ;;  %p1266_p11 = por %p1265_p10, %p1264_p9 }
 0x19d   :  { %v724_v1 = vrot.slane %v722_v37, 1 }
 0x19e   :  { %835 = vrot.lane.b32.xlu1 %v832_v39, %s1291_s1  ;;  %v1069_v39 = vunpack.c.l.s4 %v1294_v38  ;;  %p1267_p12 = pnand %p1266_p11, %p1260_p8 }
 0x19f   :  { %v725_v41 = vor.u32 %v724_v1, %v720_v40 }
 0x1a1   :  { %v730_v43 = vsel %vm706_vm7, %v725_v41, %v729_v42  ;;  %v1070_v42 = vunpack.c.0.s8 %v1069_v39 }
 0x1a2   :  { %733 = vrot.lane.b32.xlu0 %v730_v43, %s1293_s19 }
 0x209   :  { %v834_v45 = vpop.permute.xlu1 %833 }
 0x20d   :  { %v732_v44 = vpop.permute.xlu0 %731 }
 0x20e   :  { %v839_v46 = vsel %vm837_vm8, %v628_v0, %v732_v44 }
 0x20f   :  { %v844_v47 = vsel %vm842_vm9, %v839_v46, %v834_v45  ;;  %v1073_v46 = vsub.s32 %v1070_v42, %v1334_v2 }
 0x210   :  { %1153 = vmatmul.mubr.msk.bf16.vlgmr.msra.gmra.mrb[0].mxu1 %vm847_vm10, %v844_v47  ;;  %v836_v48 = vpop.permute.xlu1 %835 }
 0x211   :  { %991 = vmatprep.mubr.bf16.mxu1 %v1292_v33 }
 0x214   :  { %v734_v25 = vpop.permute.xlu0 %733 }
 0x215   :  { %v841_v49 = vsel %vm837_vm8, %v677_v32, %v734_v25 }
 0x216   :  { %v846_v50 = vsel %vm842_vm9, %v841_v49, %v836_v48 }
 0x218   :  { %1154 = vmatmul.mubr.msk.bf16.gmra.mrb[4].mxu1 %vm847_vm10, %v846_v50 }
 0x2e3   :  { %v983_v52 = vpop.f32.mrb[0].mxu1 }
 0x2e4   :  { %v985_v53 = vpop.f32.mrb[1].mxu1 }
 0x2e5   :  { %v987_v54 = vpop.f32.mrb[2].mxu1 }
 0x2e6   :  { %v1009_v55 = vsel %vm1006_vm11, %v987_v54, -inf  ;;  %v989_v56 = vpop.f32.mrb[3].mxu1 }
 0x2e7   :  { %v1015_v57 = vmax.f32 %v983_v52, %v1009_v55  ;;  %v1010_v58 = vsel %vm1006_vm11, %v989_v56, -inf }
 0x2e8   :  { %v1022_v59 = vmax.f32 %v985_v53, %v1010_v58 }
 0x2e9   :  { %v1016_v60 = vrot.slane %v1015_v57, 4 }
 0x2ea   :  { %v1023_v61 = vrot.slane %v1022_v59, 4 }
 0x2eb   :  { %v1017_v62 = vmax.f32 %v1015_v57, %v1016_v60  ;;  %v993_v63 = vpop.f32.mrb[4].mxu1 }
 0x2ec   :  { %v1024_v0 = vmax.f32 %v1022_v59, %v1023_v61  ;;  %v995_v5 = vpop.f32.mrb[5].mxu1 }
 0x2ed   :  { %v1018_v6 = vrot.slane %v1017_v62, 2  ;;  %v997_v7 = vpop.f32.mrb[6].mxu1 }
 0x2ee   :  { %v1025_v9 = vrot.slane %v1024_v0, 2  ;;  %v1013_v10 = vsel %vm1006_vm11, %v997_v7, -inf  ;;  %v999_v11 = vpop.f32.mrb[7].mxu1 }
 0x2ef   :  { %v1019_v12 = vmax.f32 %v1017_v62, %v1018_v6  ;;  %v1029_v13 = vmax.f32 %v993_v63, %v1013_v10  ;;  %v1014_v14 = vsel %vm1006_vm11, %v999_v11, -inf }
 0x2f0   :  { %v1026_v15 = vmax.f32 %v1024_v0, %v1025_v9  ;;  %v1036_v16 = vmax.f32 %v995_v5, %v1014_v14 }
 0x2f1   :  { %v1020_v18 = vrot.slane %v1019_v12, 1  ;;  %v1030_v19 = vrot.slane %v1029_v13, 4 }
 0x2f2   :  { %v1027_v21 = vrot.slane %v1026_v15, 1  ;;  %v1037_v22 = vrot.slane %v1036_v16, 4 }
 0x2f3   :  { %v1021_v23 = vmax.f32 %v1019_v12, %v1020_v18  ;;  %v1031_v24 = vmax.f32 %v1029_v13, %v1030_v19 }
 0x2f4   :  { %v1028_v26 = vmax.f32 %v1026_v15, %v1027_v21  ;;  %v1038_v27 = vmax.f32 %v1036_v16, %v1037_v22 }
 0x2f5   :  { %v1055_v28 = vadd.f32 %v1048_v17, %v1021_v23  ;;  %v1032_v29 = vrot.slane %v1031_v24, 2 }
 0x2f6   :  { %v1056_v30 = vadd.f32 %v1052_v20, %v1028_v26  ;;  %v1039_v31 = vrot.slane %v1038_v27, 2 }
 0x2f7   :  { %v1059_v32 = vmax.f32 %v1055_v28, 0.0  ;;  %v1033_v33 = vmax.f32 %v1031_v24, %v1032_v29 }
 0x2f8   :  { %v1060_v34 = vmax.f32 %v1056_v30, 0.0  ;;  %v1040_v35 = vmax.f32 %v1038_v27, %v1039_v31 }
 0x2f9   :  { %v1034_v4 = vrot.slane %v1033_v33, 1 }
 0x2fa   :  { %v1067_v36 = vcombine.low %v1059_v32, %v1060_v34  ;;  %v1041_v37 = vrot.slane %v1040_v35, 1 }
 0x2fb   :  { %v1035_v3 = vmax.f32 %v1033_v33, %v1034_v4 }
 0x2fc   :  { %v1042_v40 = vmax.f32 %v1040_v35, %v1041_v37  ;;  %v1074_v25 = vrot.slane %v1067_v36, %v1073_v46 }
 0x2fd   :  { %v1057_v1 = vadd.f32 %v1048_v17, %v1035_v3 }
 0x2fe   :  { %v1058_v41 = vadd.f32 %v1052_v20, %v1042_v40 }
 0x2ff   :  { %v1061_v43 = vmax.f32 %v1057_v1, 0.0 }
 0x300   :  { %v1062_v44 = vmax.f32 %v1058_v41, 0.0 }
 0x302   :  { %v1075_v45 = vcombine.low %v1061_v43, %v1062_v44 }
 0x304   :  { %v1082_v47 = vrot.slane %v1075_v45, %v1073_v46 }
 0x306   :  { %v1087_v48 = vrot.slane %v1082_v47, 7 }
 0x308   :  { %v1089_v49 = vsel %vm1088_vm12, %v1087_v48, %v1074_v25 }
 0x309   :  { %v1091_v50 = vsel %vm1090_vm13, %v1087_v48, %v1089_v49 }
 0x30a   :  { %v1093_v51 = vsel %vm1092_vm14, %v1087_v48, %v1091_v50 }
 0x30b   :  { %v1095_v52 = vsel %vm1094_vm15, %v1087_v48, %v1093_v51 }
 0x30c   :  { %1097 = vst [vmem:[#allocation5] sm:$0xf] %v1095_v52 }
 0x30d   :  { %1270 = shalt.err (!%p1267_p12)
}
 0x30e   :  { %s1271_s26 = scalar_lea.hbm %s1496_s4, 64 }
 0x30f   :  { %p1272_p13 = scmp.ne.s32.totalorder %s1496_s4, %s1271_s26  ;;  %p1275_p0 = scmp.lt.u32.totalorder %s1271_s26, %s1496_s4 }
 0x311   :  { %p1277_p1 = pnand %p1275_p0, %p1272_p13 }
 0x313   :  { %1280 = shalt.err (!%p1277_p1)
}
 0x314   :  { %1107 = dma.vmem_to_hbm [thread:$0]  %s1105_s22, 64, %s1496_s4, [#allocation4]  }
 0x315   :  { %1283 = dma.done.wait [#allocation4], 64  }
 0x316   :  { %1284 = vsyncadd [#allocation4], 4294967232 }
 0x317   :  { %1111 = vsyncpa [#allocation3], 1 }
 0x318   :  { %1112 = vsyncpa [#allocation4], 1 }

// kernel: tpu_custom_call.1
= control target key start
LH: loop header
LB: loop body
LE: loop exit
PB: predicated region body
PF: predicated region fallthrough
CT: control target
= control target key end

     0   :  { %8 = vsyncpa [#allocation3], 0  ;;  %s571_s0 = inlined_call_operand.vmem [shape: bf16[2,18,32], index: 0, kind: input, shape index: {}]   ;;  %s572_s1 = inlined_call_operand.hbm [shape: bf16[128,256], index: 1, kind: input, shape index: {}]   ;;  %s573_s2 = inlined_call_operand.vmem [shape: f32[1,256], index: 2, kind: input, shape index: {}]   ;;  %s574_s3 = inlined_call_operand.hbm [shape: f32[2,256], index: 3, kind: output, shape index: {}]  }
   0x1   :  { %9 = vsyncpa [#allocation4], 0  ;;  %s490_s12 = smov [#allocation2]   ;;  %s442_s16 = scalar_lea.hbm %s572_s1, 2048 }
   0x2   :  { %s17_s13 = sshll.u32 %s490_s12, 4  ;;  %p443_p0 = scmp.ne.s32.totalorder %s572_s1, %s442_s16  ;;  %s18_s13 = int_to_ptr.vmem [resolvable:$true] %s17_s13 }
   0x3   :  { %p446_p1 = scmp.lt.u32.totalorder %s442_s16, %s572_s1 }
   0x5   :  { %p448_p2 = pnand %p446_p1, %p443_p0 }
   0x7   :  { %451 = shalt.err (!%p448_p2)
}
   0x8   :  { %s452_s21 = scalar_lea.vmem %s18_s13, 2048  ;;  %p457_p4 = scmp.lt.s32.totalorder %s18_s13, %s18_s13 }
   0x9   :  { %p453_p3 = scmp.ne.s32.totalorder %s18_s13, %s452_s21  ;;  %p458_p5 = scmp.lt.s32.totalorder %s452_s21, %s452_s21 }
   0xb   :  { %p459_p6 = por %p458_p5, %p457_p4 }
   0xd   :  { %p460_p7 = pnand %p459_p6, %p453_p3 }
   0xf   :  { %463 = shalt.err (!%p460_p7)
}
  0x10   :  { %s491_s22 = smov 128   ;;  %s492_s23 = smov 8  }
  0x11   :  { %23 = dma.hbm_to_vmem [thread:$0]  %s572_s1, 2048, %s18_s13, [#allocation3], %s491_s22, %s491_s22, %s492_s23  }
  0x12   :  { %486 = dma.done.wait [#allocation3], 2048  }
  0x13   :  { %487 = vsyncadd [#allocation3], 4294965248  ;;  %v533_v0 = vld [vmem:[%s571_s0 + $0xc] sm:$0xff]   ;;  %v415_v1 = vld [vmem:[%s571_s0 + $0x14] ss:$0 sps:$4 sm:$0x11]   ;;  %v257_v49 = vlaneseq }
  0x14   :  { %v541_v2 = vld [vmem:[%s571_s0] sm:$0xff]   ;;  %v66_v3 = vshrl.u32 %v533_v0, 16  ;;  %v68_v4 = vshll.u32 %v533_v0, 16  ;;  %v73_v5 = vshll.u32 %v415_v1, 16  ;;  %v493_v7 = vmov 0   ;;  %s495_s6 = smov 64  }
  0x15   :  { %v417_v6 = vld [vmem:[%s571_s0 + $0x8] ss:$0 sps:$4 sm:$0x11]   ;;  %236 = vmatprep.mubr.bf16.mxu0 %v493_v7  ;;  %246 = vmatprep.mubr.bf16.mxu1 %v493_v7  ;;  %vm52_vm0 = vsmask.f32 7424  ;;  %v54_v8 = vshrl.u32 %v541_v2, 16 }
  0x16   :  { %v56_v9 = vshll.u32 %v541_v2, 16  ;;  %v70_v10 = vrot.slane %v68_v4, 1  ;;  %v75_v11 = vrot.slane %v73_v5, 1  ;;  %v61_v12 = vshll.u32 %v417_v6, 16  ;;  %v418_v13 = vld [vmem:[#allocation2 + $0x4] ss:$8 sps:$4 sm:$0xff]  }
  0x17   :  { %v420_v15 = vld [vmem:[#allocation2] ss:$8 sps:$4 sm:$0xff]   ;;  %v85_v18 = vrot.slane %v533_v0, 1  ;;  %v86_v19 = vrot.slane %v415_v1, 1  ;;  %204 = vmatprep.subr.bf16.mxu0 %v418_v13  ;;  %390 = vmatprep.subr.bf16.mxu1 %v418_v13  ;;  %v421_v20 = vld [vmem:[#allocation2 + $0x14] ss:$8 sps:$4 sm:$0xff]  }
  0x18   :  { %v58_v14 = vrot.slane %v56_v9, 1  ;;  %v71_v16 = vor.u32 %v70_v10, %v66_v3  ;;  %v63_v17 = vrot.slane %v61_v12, 1  ;;  %vm81_vm1 = vcmask 1046528   ;;  %205 = vmatpush1.bf16.msra.mxu0 %v420_v15  ;;  %398 = vmatpush1.bf16.msra.mxu1 %v420_v15  ;;  %v423_v24 = vld [vmem:[#allocation2 + $0x10] ss:$8 sps:$4 sm:$0xff]   ;;  %s494_s0 = smov 32  }
  0x19   :  { %v82_v22 = vrot.slane %v541_v2, 1  ;;  %v83_v23 = vrot.slane %v417_v6, 1  ;;  %206 = vmatprep.subr.bf16.mxu0 %v421_v20  ;;  %391 = vmatprep.subr.bf16.mxu1 %v421_v20  ;;  %v424_v26 = vld [vmem:[#allocation2 + $0x24] ss:$8 sps:$4 sm:$0xff]   ;;  %v87_v28 = vsel %vm81_vm1, %v85_v18, %v86_v19  ;;  %v426_v30 = vld [vmem:[#allocation2 + $0x20] ss:$8 sps:$4 sm:$0xff]  }
  0x1a   :  { %v59_v21 = vor.u32 %v58_v14, %v54_v8  ;;  %v76_v25 = vsel %vm52_vm0, %v71_v16, %v75_v11  ;;  %v427_v31 = vld [vmem:[#allocation2 + $0x34] ss:$8 sps:$4 sm:$0xff]   ;;  %v429_v32 = vld [vmem:[#allocation2 + $0x30] ss:$8 sps:$4 sm:$0xff]   ;;  %v430_v33 = vld [vmem:[#allocation2 + $0x44] ss:$8 sps:$4 sm:$0xff]  }
  0x1b   :  { %79 = vrot.lane.b32.xlu0 %v76_v25, %s494_s0  ;;  %v84_v29 = vsel %vm81_vm1, %v82_v22, %v83_v23  ;;  %v432_v34 = vld [vmem:[#allocation2 + $0x40] ss:$8 sps:$4 sm:$0xff]   ;;  %v433_v35 = vld [vmem:[#allocation2 + $0x54] ss:$8 sps:$4 sm:$0xff]   ;;  %v435_v36 = vld [vmem:[#allocation2 + $0x50] ss:$8 sps:$4 sm:$0xff]  }
  0x1c   :  { %v64_v27 = vsel %vm52_vm0, %v59_v21, %v63_v17  ;;  %207 = vmatpush1.bf16.msra.mxu0 %v423_v24  ;;  %399 = vmatpush1.bf16.msra.mxu1 %v423_v24  ;;  %v436_v37 = vld [vmem:[#allocation2 + $0x64] ss:$8 sps:$4 sm:$0xff]   ;;  %v438_v38 = vld [vmem:[#allocation2 + $0x60] ss:$8 sps:$4 sm:$0xff]   ;;  %v439_v39 = vld [vmem:[#allocation2 + $0x74] ss:$8 sps:$4 sm:$0xff]  }
  0x1d   :  { %77 = vrot.lane.b32.xlu1 %v64_v27, %s494_s0  ;;  %208 = vmatprep.subr.bf16.mxu0 %v424_v26  ;;  %v441_v40 = vld [vmem:[#allocation2 + $0x70] ss:$8 sps:$4 sm:$0xff]   ;;  %vm92_vm2 = vcmask 261120   ;;  %vm97_vm3 = vcmask 523264   ;;  %vm102_vm4 = vcmask 785408   ;;  %v258_v50 = vshrl.u32 %v257_v49, 7 }
  0x1e   :  { %392 = vmatprep.subr.bf16.mxu1 %v424_v26  ;;  %v298_v15 = vld [vmem:[%s573_s2] sm:$0x3]  ;;  %v496_v22 = vmov 1983009808   ;;  %vm343_vm6 = vcmask 1041409   ;;  %vm345_vm7 = vcmask 1043459  }
  0x1f   :  { %90 = vrot.lane.b32.xlu0 %v87_v28, %s495_s6  ;;  %v259_v51 = vadd.s32 8, %v258_v50  ;;  %v302_v11 = vsub.s32 0, %v258_v50  ;;  %v306_v16 = vsub.s32 1, %v258_v50  ;;  %v324_v23 = vunpack.c.l.s4 %v496_v22  ;;  %s497_s2 = smov [#allocation5]  }
  0x20   :  { %209 = vmatpush1.bf16.msra.mxu0 %v426_v30  ;;  %400 = vmatpush1.bf16.msra.mxu1 %v426_v30  ;;  %vm347_vm8 = vcmask 1045509   ;;  %s359_s9 = sshll.u32 %s497_s2, 4  ;;  %vm349_vm9 = vcmask 1047559   ;;  %s360_s9 = int_to_ptr.vmem [resolvable:$true] %s359_s9 }
  0x21   :  { %88 = vrot.lane.b32.xlu1 %v84_v29, %s495_s6  ;;  %210 = vmatprep.subr.bf16.mxu0 %v427_v31  ;;  %vm261_vm5 = vcmp.lt.s32.totalorder %v259_v51, 14  ;;  %v303_v24 = vrot.slane %v298_v15, %v302_v11  ;;  %v307_v28 = vrot.slane %v298_v15, %v306_v16  ;;  %s464_s10 = scalar_lea.vmem %s360_s9, 64  ;;  %p469_p9 = scmp.lt.s32.totalorder %s360_s9, %s360_s9 }
  0x22   :  { %393 = vmatprep.subr.bf16.mxu1 %v427_v31  ;;  %p465_p8 = scmp.ne.s32.totalorder %s360_s9, %s464_s10  ;;  %p470_p10 = scmp.lt.s32.totalorder %s464_s10, %s464_s10 }
  0x24   :  { %211 = vmatpush1.bf16.msra.mxu0 %v429_v32  ;;  %401 = vmatpush1.bf16.msra.mxu1 %v429_v32  ;;  %p471_p11 = por %p470_p10, %p469_p9 }
  0x25   :  { %212 = vmatprep.subr.bf16.mxu0 %v430_v33  ;;  %394 = vmatprep.subr.bf16.mxu1 %v430_v33 }
  0x26   :  { %p472_p12 = pnand %p471_p11, %p465_p8 }
  0x28   :  { %213 = vmatpush1.bf16.msra.mxu0 %v432_v34  ;;  %402 = vmatpush1.bf16.msra.mxu1 %v432_v34  ;;  %v325_v34 = vunpack.c.0.s8 %v324_v23 }
  0x29   :  { %214 = vmatprep.subr.bf16.mxu0 %v433_v35  ;;  %395 = vmatprep.subr.bf16.mxu1 %v433_v35 }
  0x2c   :  { %215 = vmatpush1.bf16.msra.mxu0 %v435_v36  ;;  %403 = vmatpush1.bf16.msra.mxu1 %v435_v36 }
  0x2d   :  { %216 = vmatprep.subr.bf16.mxu0 %v436_v37  ;;  %396 = vmatprep.subr.bf16.mxu1 %v436_v37 }
  0x30   :  { %217 = vmatpush1.bf16.msra.mxu0 %v438_v38  ;;  %404 = vmatpush1.bf16.msra.mxu1 %v438_v38 }
  0x31   :  { %218 = vmatprep.subr.bf16.mxu0 %v439_v39  ;;  %397 = vmatprep.subr.bf16.mxu1 %v439_v39 }
  0x34   :  { %219 = vmatpush1.bf16.msra.mxu0 %v441_v40  ;;  %405 = vmatpush1.bf16.msra.mxu1 %v441_v40 }
  0x8d   :  { %v80_v41 = vpop.permute.xlu0 %79 }
  0x8e   :  { %v96_v44 = vsel %vm92_vm2, %v533_v0, %v80_v41 }
  0x8f   :  { %v78_v42 = vpop.permute.xlu1 %77 }
  0x90   :  { %v94_v43 = vsel %vm92_vm2, %v541_v2, %v78_v42 }
  0x91   :  { %v91_v45 = vpop.permute.xlu0 %90 }
  0x92   :  { %v101_v46 = vsel %vm97_vm3, %v96_v44, %v91_v45 }
  0x93   :  { %v89_v47 = vpop.permute.xlu1 %88  ;;  %389 = vmatmul.mubr.msk.bf16.vlgmr.msra.gmra.mrb[0].mxu1 %vm102_vm4, %v101_v46 }
  0x94   :  { %v99_v48 = vsel %vm97_vm3, %v94_v43, %v89_v47  ;;  %v328_v43 = vsub.s32 %v325_v34, %v258_v50 }
  0x95   :  { %388 = vmatmul.mubr.msk.bf16.vlgmr.msra.gmra.mrb[0].mxu0 %vm102_vm4, %v99_v48 }
 0x166   :  { %v248_v52 = vpop.f32.mrb[0].mxu1 }
 0x167   :  { %v250_v54 = vpop.f32.mrb[1].mxu1 }
 0x168   :  { %v238_v53 = vpop.f32.mrb[0].mxu0  ;;  %v252_v56 = vpop.f32.mrb[2].mxu1 }
 0x169   :  { %v240_v55 = vpop.f32.mrb[1].mxu0  ;;  %v268_v58 = vsel %vm261_vm5, %v252_v56, -inf  ;;  %v254_v59 = vpop.f32.mrb[3].mxu1 }
 0x16a   :  { %v242_v57 = vpop.f32.mrb[2].mxu0  ;;  %v284_v61 = vmax.f32 %v248_v52, %v268_v58  ;;  %v269_v63 = vsel %vm261_vm5, %v254_v59, -inf }
 0x16b   :  { %v264_v60 = vsel %vm261_vm5, %v242_v57, -inf  ;;  %v244_v62 = vpop.f32.mrb[3].mxu0  ;;  %v291_v2 = vmax.f32 %v250_v54, %v269_v63 }
 0x16c   :  { %v270_v0 = vmax.f32 %v238_v53, %v264_v60  ;;  %v265_v1 = vsel %vm261_vm5, %v244_v62, -inf  ;;  %v285_v3 = vrot.slane %v284_v61, 4 }
 0x16d   :  { %v277_v4 = vmax.f32 %v240_v55, %v265_v1  ;;  %v292_v6 = vrot.slane %v291_v2, 4 }
 0x16e   :  { %v271_v5 = vrot.slane %v270_v0, 4  ;;  %v286_v7 = vmax.f32 %v284_v61, %v285_v3 }
 0x16f   :  { %v278_v8 = vrot.slane %v277_v4, 4  ;;  %v293_v10 = vmax.f32 %v291_v2, %v292_v6 }
 0x170   :  { %v272_v9 = vmax.f32 %v270_v0, %v271_v5  ;;  %v287_v12 = vrot.slane %v286_v7, 2 }
 0x171   :  { %v279_v13 = vmax.f32 %v277_v4, %v278_v8  ;;  %v294_v17 = vrot.slane %v293_v10, 2 }
 0x172   :  { %v273_v14 = vrot.slane %v272_v9, 2  ;;  %v288_v18 = vmax.f32 %v286_v7, %v287_v12 }
 0x173   :  { %v280_v19 = vrot.slane %v279_v13, 2  ;;  %v295_v21 = vmax.f32 %v293_v10, %v294_v17 }
 0x174   :  { %v274_v20 = vmax.f32 %v272_v9, %v273_v14  ;;  %v289_v25 = vrot.slane %v288_v18, 1 }
 0x175   :  { %v281_v26 = vmax.f32 %v279_v13, %v280_v19  ;;  %v296_v29 = vrot.slane %v295_v21, 1 }
 0x176   :  { %v275_v27 = vrot.slane %v274_v20, 1  ;;  %v290_v30 = vmax.f32 %v288_v18, %v289_v25 }
 0x177   :  { %v282_v31 = vrot.slane %v281_v26, 1  ;;  %v297_v33 = vmax.f32 %v295_v21, %v296_v29 }
 0x178   :  { %v276_v32 = vmax.f32 %v274_v20, %v275_v27  ;;  %v312_v35 = vadd.f32 %v303_v24, %v290_v30 }
 0x179   :  { %v283_v36 = vmax.f32 %v281_v26, %v282_v31  ;;  %v313_v38 = vadd.f32 %v307_v28, %v297_v33 }
 0x17a   :  { %v310_v37 = vadd.f32 %v303_v24, %v276_v32  ;;  %v316_v39 = vmax.f32 %v312_v35, 0.0 }
 0x17b   :  { %v311_v40 = vadd.f32 %v307_v28, %v283_v36  ;;  %v317_v42 = vmax.f32 %v313_v38, 0.0 }
 0x17c   :  { %v314_v41 = vmax.f32 %v310_v37, 0.0 }
 0x17d   :  { %v315_v44 = vmax.f32 %v311_v40, 0.0  ;;  %v330_v45 = vcombine.low %v316_v39, %v317_v42 }
 0x17f   :  { %v322_v46 = vcombine.low %v314_v41, %v315_v44  ;;  %v337_v47 = vrot.slane %v330_v45, %v328_v43 }
 0x181   :  { %v329_v48 = vrot.slane %v322_v46, %v328_v43  ;;  %v342_v49 = vrot.slane %v337_v47, 7 }
 0x183   :  { %v344_v51 = vsel %vm343_vm6, %v342_v49, %v329_v48 }
 0x184   :  { %v346_v52 = vsel %vm345_vm7, %v342_v49, %v344_v51 }
 0x185   :  { %v348_v53 = vsel %vm347_vm8, %v342_v49, %v346_v52 }
 0x186   :  { %v350_v54 = vsel %vm349_vm9, %v342_v49, %v348_v53 }
 0x187   :  { %352 = vst [vmem:[#allocation5] sm:$0xf] %v350_v54 }
 0x188   :  { %475 = shalt.err (!%p472_p12)
}
 0x189   :  { %s476_s13 = scalar_lea.hbm %s574_s3, 64 }
 0x18a   :  { %p477_p13 = scmp.ne.s32.totalorder %s574_s3, %s476_s13  ;;  %p480_p0 = scmp.lt.u32.totalorder %s476_s13, %s574_s3 }
 0x18c   :  { %p482_p1 = pnand %p480_p0, %p477_p13 }
 0x18e   :  { %485 = shalt.err (!%p482_p1)
}
 0x18f   :  { %362 = dma.vmem_to_hbm [thread:$0]  %s360_s9, 64, %s574_s3, [#allocation4]  }
 0x190   :  { %488 = dma.done.wait [#allocation4], 64  }
 0x191   :  { %489 = vsyncadd [#allocation4], 4294967232 }
 0x192   :  { %366 = vsyncpa [#allocation3], 1 }
 0x193   :  { %367 = vsyncpa [#allocation4], 1 }

</bundles_post_ra>
